<compile_context>
chip_gen: v7x
topology: tpu7x:2x2x1
jax: 0.10.0
libtpu: 0.0.40
codegen_flags: <defaults>
</compile_context>

<pallas_src>
import jax
import jax.numpy as jnp
from jax.experimental import pallas as pl
from jax.experimental.pallas import tpu as pltpu


def ffn_kernel(x_ref, w1_ref, b1_ref, w2_ref, b2_ref, out_ref):
    # x_ref:  (tm, C)     row tile
    # w1_ref: (C, 4C)     full first-layer weight (resident in VMEM)
    # b1_ref: (1, 4C)     first-layer bias
    # w2_ref: (4C, C)     full second-layer weight
    # b2_ref: (1, C)      second-layer bias
    # out_ref:(tm, C)
    x = x_ref[...]

    # Linear1 + ReLU  (MXU matmul, f32 accumulation; bias broadcast on VPU)
    h = jnp.dot(x, w1_ref[...], preferred_element_type=jnp.float32)
    h = jnp.maximum(h + b1_ref[...], 0.0)

    # Linear2
    y = jnp.dot(h.astype(w2_ref.dtype), w2_ref[...],
                preferred_element_type=jnp.float32)
    y = y + b2_ref[...]

    # Dropout == identity in eval mode.
    out_ref[...] = y.astype(out_ref.dtype)


def _pick_row_tile(m):
    """Largest row tile <= 512 that divides M (keeps tiles near the sweet spot
    while satisfying the (8, 128) block constraint); fall back to full M."""
    for cand in (512, 256, 128, 64, 32, 16, 8):
        if m % cand == 0:
            return cand
    return m


def feed_forward(x, w1, b1, w2, b2):
    """x: (..., C); w1: (C, 4C); b1: (4C,); w2: (4C, C); b2: (C,) -> (..., C)."""
    orig_shape = x.shape
    C = orig_shape[-1]
    H = w1.shape[1]                       # hidden = 4 * n_embd
    M = 1
    for d in orig_shape[:-1]:
        M *= int(d)

    x2 = x.reshape(M, C)
    b1_2d = b1.reshape(1, H)
    b2_2d = b2.reshape(1, C)

    tm = _pick_row_tile(M)
    grid = (M // tm,)

    bytes_per_elt = x.dtype.itemsize
    cost = pl.CostEstimate(
        flops=4 * M * C * H,                              # two matmuls
        transcendentals=0,
        bytes_accessed=bytes_per_elt * (2 * M * C + 2 * C * H + H + C),
    )

    out2 = pl.pallas_call(
        ffn_kernel,
        out_shape=jax.ShapeDtypeStruct((M, C), x.dtype),
        grid_spec=pltpu.PrefetchScalarGridSpec(
            num_scalar_prefetch=0,
            grid=grid,
            in_specs=[
                pl.BlockSpec((tm, C), lambda i: (i, 0)),   # x row tile
                pl.BlockSpec((C, H), lambda i: (0, 0)),    # W1 (resident)
                pl.BlockSpec((1, H), lambda i: (0, 0)),    # b1
                pl.BlockSpec((H, C), lambda i: (0, 0)),    # W2 (resident)
                pl.BlockSpec((1, C), lambda i: (0, 0)),    # b2
            ],
            out_specs=pl.BlockSpec((tm, C), lambda i: (i, 0)),
        ),
        compiler_params=pltpu.CompilerParams(
            dimension_semantics=("parallel",),
        ),
        cost_estimate=cost,
    )(x2, w1, b1_2d, w2, b2_2d)

    return out2.reshape(orig_shape)


def reference_feed_forward(x, w1, b1, w2, b2):
    """Pure-JAX reference matching the PyTorch forward (dropout = identity)."""
    h = jnp.maximum(x @ w1 + b1, 0.0)
    return h @ w2 + b2


if __name__ == "__main__":
    # Small shapes consistent with the module: batch=2, seq=8, n_embd=32 -> hidden=128.
    B, T, C = 2, 8, 32
    H = 4 * C

    key = jax.random.PRNGKey(0)
    kx, kw1, kb1, kw2, kb2 = jax.random.split(key, 5)

    x = jax.random.normal(kx, (B, T, C), dtype=jnp.float32)

    # Mimic nn.Linear's uniform(-1/sqrt(fan_in), 1/sqrt(fan_in)) init.
    bound1 = 1.0 / (C ** 0.5)
    w1 = jax.random.uniform(kw1, (C, H), jnp.float32, -bound1, bound1)
    b1 = jax.random.uniform(kb1, (H,), jnp.float32, -bound1, bound1)
    bound2 = 1.0 / (H ** 0.5)
    w2 = jax.random.uniform(kw2, (H, C), jnp.float32, -bound2, bound2)
    b2 = jax.random.uniform(kb2, (C,), jnp.float32, -bound2, bound2)

    out = feed_forward(x, w1, b1, w2, b2)
    out = jax.block_until_ready(out)

    ref = reference_feed_forward(x, w1, b1, w2, b2)
    assert out.shape == (B, T, C)
    assert jnp.allclose(out, ref, atol=1e-5, rtol=1e-5), "mismatch vs reference"

    print("KERNEL_OK")
</pallas_src>

<mosaic_0001>
module attributes {stable_mosaic.version = 11 : i64} {
  func.func @ffn_kernel(%arg0: i32, %arg1: memref<16x32xf32, #tpu.memory_space<vmem>>, %arg2: memref<32x128xf32, #tpu.memory_space<vmem>>, %arg3: memref<1x128xf32, #tpu.memory_space<vmem>>, %arg4: memref<128x32xf32, #tpu.memory_space<vmem>>, %arg5: memref<1x32xf32, #tpu.memory_space<vmem>>, %arg6: memref<16x32xf32, #tpu.memory_space<vmem>>) attributes {dimension_semantics = [#tpu.dimension_semantics<parallel>], iteration_bounds = array<i64: 1>, scalar_prefetch = 0 : i64, scratch_operands = 0 : i64, tpu.core_type = #tpu.core_type<tc>, window_params = [{transform_indices = @transform_0, window_bounds = array<i64: 16, 32>}, {pipeline_mode = #tpu.pipeline_mode<synchronous>, transform_indices = @transform_1, window_bounds = array<i64: 32, 128>}, {pipeline_mode = #tpu.pipeline_mode<synchronous>, transform_indices = @transform_2, window_bounds = array<i64: 1, 128>}, {pipeline_mode = #tpu.pipeline_mode<synchronous>, transform_indices = @transform_3, window_bounds = array<i64: 128, 32>}, {pipeline_mode = #tpu.pipeline_mode<synchronous>, transform_indices = @transform_4, window_bounds = array<i64: 1, 32>}, {transform_indices = @transform_5, window_bounds = array<i64: 16, 32>}]} {
    %c0 = arith.constant 0 : index
    %c0_0 = arith.constant 0 : index
    %0 = vector.load %arg1[%c0, %c0_0] : memref<16x32xf32, #tpu.memory_space<vmem>>, vector<16x32xf32>
    %c0_1 = arith.constant 0 : index
    %c0_2 = arith.constant 0 : index
    %1 = vector.load %arg2[%c0_1, %c0_2] : memref<32x128xf32, #tpu.memory_space<vmem>>, vector<32x128xf32>
    %cst = arith.constant dense<0.000000e+00> : vector<16x128xf32>
    %2 = tpu.matmul %0, %1, %cst {dimension_numbers = #tpu.dot_dimension_numbers<[1], [0], [0], [1], [0, 0, 1, 1], [], []>} : vector<16x32xf32>, vector<32x128xf32>, vector<16x128xf32> -> vector<16x128xf32>
    %c0_3 = arith.constant 0 : index
    %c0_4 = arith.constant 0 : index
    %3 = vector.load %arg3[%c0_3, %c0_4] : memref<1x128xf32, #tpu.memory_space<vmem>>, vector<1x128xf32>
    %4 = vector.broadcast %3 : vector<1x128xf32> to vector<16x128xf32>
    %5 = arith.addf %2, %4 : vector<16x128xf32>
    %cst_5 = arith.constant 0.000000e+00 : f32
    %6 = vector.broadcast %cst_5 : f32 to vector<16x128xf32>
    %7 = arith.maximumf %5, %6 : vector<16x128xf32>
    %c0_6 = arith.constant 0 : index
    %c0_7 = arith.constant 0 : index
    %8 = vector.load %arg4[%c0_6, %c0_7] : memref<128x32xf32, #tpu.memory_space<vmem>>, vector<128x32xf32>
    %cst_8 = arith.constant dense<0.000000e+00> : vector<16x32xf32>
    %9 = tpu.matmul %7, %8, %cst_8 {dimension_numbers = #tpu.dot_dimension_numbers<[1], [0], [0], [1], [0, 0, 1, 1], [], []>} : vector<16x128xf32>, vector<128x32xf32>, vector<16x32xf32> -> vector<16x32xf32>
    %c0_9 = arith.constant 0 : index
    %c0_10 = arith.constant 0 : index
    %10 = vector.load %arg5[%c0_9, %c0_10] : memref<1x32xf32, #tpu.memory_space<vmem>>, vector<1x32xf32>
    %11 = vector.broadcast %10 : vector<1x32xf32> to vector<16x32xf32>
    %12 = arith.addf %9, %11 : vector<16x32xf32>
    %c0_11 = arith.constant 0 : index
    %c0_12 = arith.constant 0 : index
    %13 = vector.load %arg6[%c0_11, %c0_12] : memref<16x32xf32, #tpu.memory_space<vmem>>, vector<16x32xf32>
    tpu.vector_store %arg6[%c0_11, %c0_12], %12 {strides = array<i32>} : memref<16x32xf32, #tpu.memory_space<vmem>>, vector<16x32xf32>,
    return
  }
  func.func @transform_0(%arg0: i32) -> (i32, i32) {
    %c0_i32 = arith.constant 0 : i32
    %c0_i32_0 = arith.constant 0 : i32
    return %arg0, %c0_i32 : i32, i32
  }
  func.func @transform_1(%arg0: i32) -> (i32, i32) {
    %c0_i32 = arith.constant 0 : i32
    %c0_i32_0 = arith.constant 0 : i32
    %c0_i32_1 = arith.constant 0 : i32
    return %c0_i32, %c0_i32_0 : i32, i32
  }
  func.func @transform_2(%arg0: i32) -> (i32, i32) {
    %c0_i32 = arith.constant 0 : i32
    %c0_i32_0 = arith.constant 0 : i32
    %c0_i32_1 = arith.constant 0 : i32
    return %c0_i32, %c0_i32_0 : i32, i32
  }
  func.func @transform_3(%arg0: i32) -> (i32, i32) {
    %c0_i32 = arith.constant 0 : i32
    %c0_i32_0 = arith.constant 0 : i32
    %c0_i32_1 = arith.constant 0 : i32
    return %c0_i32, %c0_i32_0 : i32, i32
  }
  func.func @transform_4(%arg0: i32) -> (i32, i32) {
    %c0_i32 = arith.constant 0 : i32
    %c0_i32_0 = arith.constant 0 : i32
    %c0_i32_1 = arith.constant 0 : i32
    return %c0_i32, %c0_i32_0 : i32, i32
  }
  func.func @transform_5(%arg0: i32) -> (i32, i32) {
    %c0_i32 = arith.constant 0 : i32
    %c0_i32_0 = arith.constant 0 : i32
    return %arg0, %c0_i32 : i32, i32
  }
}

</mosaic_0001>

<bundles_post_ra>
// kernel: tpu_custom_call.1
= control target key start
LH: loop header
LB: loop body
LE: loop exit
PB: predicated region body
PF: predicated region fallthrough
CT: control target
= control target key end

     0   :  { %vm34_vm0 = vcmask 261120   ;;  %s496_s0 = inlined_call_operand.vmem [shape: f32[16,32], index: 0, kind: input, shape index: {}]   ;;  %s497_s1 = inlined_call_operand.vmem [shape: f32[32,128], index: 1, kind: input, shape index: {}]   ;;  %s498_s2 = inlined_call_operand.vmem [shape: f32[1,128], index: 2, kind: input, shape index: {}]   ;;  %s499_s3 = inlined_call_operand.vmem [shape: f32[128,32], index: 3, kind: input, shape index: {}]   ;;  %s500_s4 = inlined_call_operand.vmem [shape: f32[1,32], index: 4, kind: input, shape index: {}]   ;;  %s501_s5 = inlined_call_operand.hbm [shape: f32[16,32], index: 5, kind: output, shape index: {}]  }
   0x1   :  { %v23_v0 = vld [vmem:[%s497_s1] sm:$0xff]  ;;  %v24_v1 = vld [vmem:[%s497_s1 + $0x8] sm:$0xff]  ;;  %v25_v2 = vld [vmem:[%s497_s1 + $0x10] sm:$0xff] }
   0x2   :  { %v308_v3 = vpack.c.bf16 %v24_v1, %v23_v0  ;;  %v26_v4 = vld [vmem:[%s497_s1 + $0x18] sm:$0xff]  ;;  %v21_v5 = vld [vmem:[%s496_s0] sm:$0xff]  ;;  %v119_v8 = vld [vmem:[%s499_s3 + $0x8] sm:$0xff] }
   0x3   :  { %v312_v6 = vpack.c.bf16 %v26_v4, %v25_v2  ;;  %270 = vmatprep.mubr.msk.f32.mxu0 %vm34_vm0, %v21_v5  ;;  %v118_v7 = vld [vmem:[%s499_s3] sm:$0xff]  ;;  %v120_v9 = vld [vmem:[%s499_s3 + $0x10] sm:$0xff]  ;;  %v121_v11 = vld [vmem:[%s499_s3 + $0x18] sm:$0xff] }
   0x4   :  { %309 = vmatprep.subr.bf16.mxu0 %v308_v3  ;;  %v316_v10 = vpack.c.bf16 %v119_v8, %v118_v7  ;;  %v320_v12 = vpack.c.bf16 %v121_v11, %v120_v9  ;;  %v122_v13 = vld [vmem:[%s499_s3 + $0x20] sm:$0xff]  ;;  %v123_v14 = vld [vmem:[%s499_s3 + $0x28] sm:$0xff] }
   0x5   :  { %311 = vmatpush3.bf16.msra.mxu0 %v308_v3 }
   0x6   :  { %313 = vmatprep.subr.bf16.mxu0 %v312_v6  ;;  %317 = vmatprep.subr.bf16.mxu1 %v316_v10 }
   0x7   :  { %319 = vmatpush3.bf16.msra.mxu1 %v316_v10 }
   0x8   :  { %10 = vsyncpa [#allocation3], 0  ;;  %321 = vmatprep.subr.bf16.mxu1 %v320_v12  ;;  %v324_v15 = vpack.c.bf16 %v123_v14, %v122_v13  ;;  %v22_v16 = vld [vmem:[%s496_s0 + $0x8] sm:$0xff]  ;;  %v124_v17 = vld [vmem:[%s499_s3 + $0x30] sm:$0xff] }
   0x9   :  { %315 = vmatpush3.bf16.msra.mxu0 %v312_v6  ;;  %v125_v18 = vld [vmem:[%s499_s3 + $0x38] sm:$0xff]  ;;  %v126_v20 = vld [vmem:[%s499_s3 + $0x40] sm:$0xff]  ;;  %v127_v21 = vld [vmem:[%s499_s3 + $0x48] sm:$0xff] }
   0xa   :  { %v328_v19 = vpack.c.bf16 %v125_v18, %v124_v17  ;;  %v332_v22 = vpack.c.bf16 %v127_v21, %v126_v20  ;;  %v128_v23 = vld [vmem:[%s499_s3 + $0x50] sm:$0xff]  ;;  %v129_v24 = vld [vmem:[%s499_s3 + $0x58] sm:$0xff]  ;;  %v130_v26 = vld [vmem:[%s499_s3 + $0x60] sm:$0xff] }
   0xb   :  { %323 = vmatpush3.bf16.msra.mxu1 %v320_v12  ;;  %v336_v25 = vpack.c.bf16 %v129_v24, %v128_v23  ;;  %v131_v27 = vld [vmem:[%s499_s3 + $0x68] sm:$0xff]  ;;  %v132_v29 = vld [vmem:[%s499_s3 + $0x70] sm:$0xff]  ;;  %v133_v30 = vld [vmem:[%s499_s3 + $0x78] sm:$0xff]  ;;  %s375_s3 = smov [#allocation2]  }
   0xc   :  { %271 = vmatmul.mubr.msk.f32.vlgmr.msra.gmra.mrb[0].mxu0 %vm34_vm0, %v22_v16  ;;  %325 = vmatprep.subr.bf16.mxu1 %v324_v15  ;;  %v340_v28 = vpack.c.bf16 %v131_v27, %v130_v26  ;;  %v344_v31 = vpack.c.bf16 %v133_v30, %v132_v29  ;;  %v234_v32 = vld [vmem:[%s498_s2] ss:$0 sm:$0xff]  ;;  %s223_s13 = sshll.u32 %s375_s3, 4  ;;  %s224_s13 = int_to_ptr.vmem [resolvable:$true] %s223_s13 }
   0xd   :  { %v237_v39 = vld [vmem:[%s500_s4] ss:$0 sm:$0xff]  ;;  %s351_s2 = scalar_lea.vmem %s224_s13, 256  ;;  %p356_p1 = scmp.lt.s32.totalorder %s224_s13, %s224_s13 }
   0xe   :  { %p352_p0 = scmp.ne.s32.totalorder %s224_s13, %s351_s2  ;;  %p357_p2 = scmp.lt.s32.totalorder %s351_s2, %s351_s2 }
   0xf   :  { %327 = vmatpush3.bf16.msra.mxu1 %v324_v15 }
  0x10   :  { %329 = vmatprep.subr.bf16.mxu1 %v328_v19  ;;  %p358_p3 = por %p357_p2, %p356_p1 }
  0x12   :  { %p359_p4 = pnand %p358_p3, %p352_p0 }
  0x13   :  { %331 = vmatpush3.bf16.msra.mxu1 %v328_v19 }
  0x14   :  { %333 = vmatprep.subr.bf16.mxu1 %v332_v22 }
  0x17   :  { %335 = vmatpush3.bf16.msra.mxu1 %v332_v22 }
  0x18   :  { %337 = vmatprep.subr.bf16.mxu1 %v336_v25 }
  0x1b   :  { %339 = vmatpush3.bf16.msra.mxu1 %v336_v25 }
  0x1c   :  { %341 = vmatprep.subr.bf16.mxu1 %v340_v28 }
  0x1f   :  { %343 = vmatpush3.bf16.msra.mxu1 %v340_v28 }
  0x20   :  { %345 = vmatprep.subr.bf16.mxu1 %v344_v31 }
  0x23   :  { %347 = vmatpush3.bf16.msra.mxu1 %v344_v31 }
  0xdf   :  { %v272_v33 = vpop.f32.mrb[0].mxu0 }
  0xe0   :  { %v113_v34 = vadd.f32 %v272_v33, %v234_v32  ;;  %v107_v35 = vpop.f32.mrb[1].mxu0 }
  0xe1   :  { %v108_v36 = vadd.f32 %v234_v32, %v107_v35 }
  0xe2   :  { %v117_v38 = vmax.f32 %v113_v34, 0.0 }
  0xe3   :  { %v116_v37 = vmax.f32 %v108_v36, 0.0 }
  0xe5   :  { %305 = vmatprep.mubr.f32.mxu1 %v116_v37 }
  0xe6   :  { %306 = vmatmul.mubr.f32.vlgmr.msra.gmra.mrb[0].mxu1 %v117_v38 }
 0x1b9   :  { %v307_v40 = vpop.f32.mrb[0].mxu1 }
 0x1ba   :  { %v213_v41 = vadd.f32 %v307_v40, %v237_v39  ;;  %v207_v42 = vpop.f32.mrb[1].mxu1 }
 0x1bb   :  { %v208_v43 = vadd.f32 %v237_v39, %v207_v42 }
 0x1bc   :  { %217 = vst.msk [vmem:[#allocation2 + $0x8] sm:$0xff] %vm34_vm0, %v213_v41 }
 0x1bd   :  { %216 = vst.msk [vmem:[#allocation2] sm:$0xff] %vm34_vm0, %v208_v43 }
 0x1be   :  { %362 = shalt.err (!%p359_p4)
}
 0x1bf   :  { %s363_s15 = scalar_lea.hbm %s501_s5, 256 }
 0x1c0   :  { %p364_p5 = scmp.ne.s32.totalorder %s501_s5, %s363_s15  ;;  %p367_p6 = scmp.lt.u32.totalorder %s363_s15, %s501_s5 }
 0x1c2   :  { %p369_p7 = pnand %p367_p6, %p364_p5 }
 0x1c4   :  { %372 = shalt.err (!%p369_p7)
}
 0x1c5   :  { %s376_s20 = smov 128   ;;  %s377_s21 = smov 8  }
 0x1c6   :  { %229 = dma.vmem_to_hbm [thread:$0]  %s224_s13, 256, %s501_s5, [#allocation3], %s376_s20, %s376_s20, %s377_s21  }
 0x1c7   :  { %373 = dma.done.wait [#allocation3], 256  }
 0x1c8   :  { %374 = vsyncadd [#allocation3], 4294967040 }
 0x1c9   :  { %233 = vsyncpa [#allocation3], 1 }

</bundles_post_ra>
